<compile_context>
chip_gen: v7x
topology: tpu7x:2x2x1
jax: 0.10.0
libtpu: 0.0.40
codegen_flags: <defaults>
</compile_context>

<pallas_src>
import jax
import jax.numpy as jnp
from jax.experimental import pallas as pl
from jax.experimental.pallas import tpu as pltpu


def ffn_kernel(x_ref, w1_ref, b1_ref, w2_ref, b2_ref, o_ref, acc_ref):
    """One (row-tile, d_ff-tile) step of y = relu(x@W1 + b1) @ W2 + b2."""
    k = pl.program_id(1)

    @pl.when(k == 0)
    def _init():
        acc_ref[...] = jnp.zeros_like(acc_ref)

    # First matmul on the MXU (bf16 operands, f32 accumulate); bias + ReLU in f32 on the VPU.
    h = jnp.dot(x_ref[...], w1_ref[...], preferred_element_type=jnp.float32)  # (tm, tk) f32
    h = jnp.maximum(h + b1_ref[...], 0.0)
    # dropout == identity at inference.

    # Second matmul: accumulate this d_ff slab's partial product into the f32 scratch.
    acc_ref[...] += jnp.dot(h.astype(w2_ref.dtype), w2_ref[...],
                            preferred_element_type=jnp.float32)               # (tm, d_in) f32

    @pl.when(k == pl.num_programs(1) - 1)
    def _finalize():
        o_ref[...] = (acc_ref[...] + b2_ref[...]).astype(o_ref.dtype)


def _pick_tile(total, target, aligns=(256, 128, 8)):
    """Largest divisor of `total` <= target that is a multiple of one of `aligns`
    (tried in order: 256 for v6e/v7x MXU fill, then 128 for v5e, then sublane 8).
    Falls back to the full extent (no tiling) if nothing divides."""
    if total <= target:
        return total
    for align in aligns:
        t = (min(target, total) // align) * align
        while t >= align:
            if total % t == 0:
                return t
            t -= align
    return total


def shared_private_feedforward(x, w1, b1, w2, b2, *, row_tile=None, ff_tile=None,
                               compute_dtype=jnp.bfloat16):
    """x: [tokens, d_in]; w1: [d_in, d_ff]; b1: [1, d_ff]; w2: [d_ff, d_in]; b2: [1, d_in]."""
    tokens, d_in = x.shape
    d_ff = w1.shape[1]
    out_dtype = x.dtype

    # Row tile ~512 so the grid has many steps (pipelined DMA, v7x megacore sharding);
    # d_ff reduction tile ~2048 so weight slabs stream HBM->VMEM exactly once per row tile.
    tm = _pick_tile(tokens, 512) if row_tile is None else row_tile
    tk = _pick_tile(d_ff, 2048, aligns=(512, 256, 128)) if ff_tile is None else ff_tile
    assert tokens % tm == 0 and d_ff % tk == 0
    # TODO(synk): ragged token counts (tokens % tm != 0) need padding or a masked tail path.

    # MXU operands in bf16; biases and accumulation stay f32.
    xc = x.astype(compute_dtype)
    w1c = w1.astype(compute_dtype)
    w2c = w2.astype(compute_dtype)
    b1c = b1.astype(jnp.float32).reshape(1, d_ff)
    b2c = b2.astype(jnp.float32).reshape(1, d_in)

    # VMEM budget: double-buffered streamed tiles + f32 accumulator + f32 intermediate.
    isz = jnp.dtype(compute_dtype).itemsize
    osz = jnp.dtype(out_dtype).itemsize
    est = (2 * tm * d_in * isz            # x tile (double-buffered)
           + 2 * d_in * tk * isz          # W1 slab
           + 2 * tk * d_in * isz          # W2 slab
           + 2 * tk * 4 + 2 * d_in * 4    # biases
           + 2 * tm * d_in * osz          # output tile
           + tm * d_in * 4                # f32 accumulator scratch
           + tm * tk * 4)                 # f32 h intermediate
    # Headroom, capped at 64 MiB so the same config still compiles on v7x (64 MiB VMEM / TC).
    vmem_limit = int(min(64 * 1024 * 1024, max(32 * 1024 * 1024, 2 * est)))

    cost = pl.CostEstimate(
        flops=4 * tokens * d_in * d_ff,           # two matmuls, 2 flops / MAC
        transcendentals=0,
        bytes_accessed=(tokens * d_in * isz + d_in * d_ff * isz + d_ff * d_in * isz
                        + d_ff * 4 + d_in * 4 + tokens * d_in * osz),
    )

    return pl.pallas_call(
        ffn_kernel,
        out_shape=jax.ShapeDtypeStruct((tokens, d_in), out_dtype),
        grid_spec=pltpu.PrefetchScalarGridSpec(
            num_scalar_prefetch=0,
            grid=(tokens // tm, d_ff // tk),
            in_specs=[
                pl.BlockSpec((tm, d_in), lambda i, k: (i, 0)),   # x row tile (resident across k)
                pl.BlockSpec((d_in, tk), lambda i, k: (0, k)),   # W1 column slab (streamed)
                pl.BlockSpec((1, tk),    lambda i, k: (0, k)),   # b1 slab
                pl.BlockSpec((tk, d_in), lambda i, k: (k, 0)),   # W2 row slab (streamed)
                pl.BlockSpec((1, d_in),  lambda i, k: (0, 0)),   # b2 (constant)
            ],
            out_specs=pl.BlockSpec((tm, d_in), lambda i, k: (i, 0)),
            scratch_shapes=[pltpu.VMEM((tm, d_in), jnp.float32)],
        ),
        compiler_params=pltpu.CompilerParams(
            dimension_semantics=("parallel", "arbitrary"),
            vmem_limit_bytes=vmem_limit,
        ),
        cost_estimate=cost,
    )(xc, w1c, b1c, w2c, b2c)


if __name__ == "__main__":
    # Small shapes consistent with the module: batch=2, seq=8, input_dim=32, ffn_dim=64.
    # NOTE: at these toy widths the lane axis is under-filled (d_in=32 < 128); production
    # use should pad feature dims to multiples of 128 for lane-dense stores.
    batch, seq, d_in, d_ff = 2, 8, 32, 64

    key = jax.random.PRNGKey(0)
    kx, kw1, kb1, kw2, kb2 = jax.random.split(key, 5)

    x = jax.random.normal(kx, (batch, seq, d_in), dtype=jnp.float32)

    # PyTorch-Linear-style init: U(-1/sqrt(fan_in), 1/sqrt(fan_in))
    bound1 = 1.0 / (d_in ** 0.5)
    bound2 = 1.0 / (d_ff ** 0.5)
    w1 = jax.random.uniform(kw1, (d_in, d_ff), jnp.float32, -bound1, bound1)
    b1 = jax.random.uniform(kb1, (1, d_ff), jnp.float32, -bound1, bound1)
    w2 = jax.random.uniform(kw2, (d_ff, d_in), jnp.float32, -bound2, bound2)
    b2 = jax.random.uniform(kb2, (1, d_in), jnp.float32, -bound2, bound2)

    # Glue: flatten (batch, seq) -> tokens for the kernel, restore afterwards.
    x2d = x.reshape(batch * seq, d_in)
    y2d = shared_private_feedforward(x2d, w1, b1, w2, b2)
    y = y2d.reshape(batch, seq, d_in)
    jax.block_until_ready(y)

    # Reference mirrors the kernel's bf16-operand / f32-accumulate compute path.
    xb, w1b, w2b = x2d.astype(jnp.bfloat16), w1.astype(jnp.bfloat16), w2.astype(jnp.bfloat16)
    h = jnp.maximum(jnp.dot(xb, w1b, preferred_element_type=jnp.float32) + b1, 0.0)
    ref = jnp.dot(h.astype(jnp.bfloat16), w2b, preferred_element_type=jnp.float32) + b2
    assert jnp.allclose(y2d, ref.astype(y2d.dtype), atol=2e-2, rtol=2e-2), "mismatch vs reference"

    print("KERNEL_OK")
</pallas_src>

<mosaic_0001>
module attributes {stable_mosaic.version = 11 : i64} {
  func.func @ffn_kernel(%arg0: i32, %arg1: i32, %arg2: memref<16x32xbf16, #tpu.memory_space<vmem>>, %arg3: memref<32x64xbf16, #tpu.memory_space<vmem>>, %arg4: memref<1x64xf32, #tpu.memory_space<vmem>>, %arg5: memref<64x32xbf16, #tpu.memory_space<vmem>>, %arg6: memref<1x32xf32, #tpu.memory_space<vmem>>, %arg7: memref<16x32xf32, #tpu.memory_space<vmem>>, %arg8: memref<16x32xf32, #tpu.memory_space<vmem>>) attributes {dimension_semantics = [#tpu.dimension_semantics<parallel>, #tpu.dimension_semantics<arbitrary>], iteration_bounds = array<i64: 1, 1>, scalar_prefetch = 0 : i64, scratch_operands = 1 : i64, tpu.core_type = #tpu.core_type<tc>, window_params = [{transform_indices = @transform_0, window_bounds = array<i64: 16, 32>}, {transform_indices = @transform_1, window_bounds = array<i64: 32, 64>}, {transform_indices = @transform_2, window_bounds = array<i64: 1, 64>}, {transform_indices = @transform_3, window_bounds = array<i64: 64, 32>}, {pipeline_mode = #tpu.pipeline_mode<synchronous>, transform_indices = @transform_4, window_bounds = array<i64: 1, 32>}, {transform_indices = @transform_5, window_bounds = array<i64: 16, 32>}]} {
    %c0_i32 = arith.constant 0 : i32
    %0 = arith.cmpi eq, %arg1, %c0_i32 : i32
    %1 = arith.extui %0 : i1 to i32
    %c0_i32_0 = arith.constant 0 : i32
    %2 = arith.cmpi ne, %1, %c0_i32_0 : i32
    scf.if %2 {
      %cst_16 = arith.constant 0.000000e+00 : f32
      %20 = vector.broadcast %cst_16 : f32 to vector<16x32xf32>
      %c0_17 = arith.constant 0 : index
      %c0_18 = arith.constant 0 : index
      %21 = vector.load %arg8[%c0_17, %c0_18] : memref<16x32xf32, #tpu.memory_space<vmem>>, vector<16x32xf32>
      tpu.vector_store %arg8[%c0_17, %c0_18], %20 {strides = array<i32>} : memref<16x32xf32, #tpu.memory_space<vmem>>, vector<16x32xf32>,
    } else {
    }
    %c0 = arith.constant 0 : index
    %c0_1 = arith.constant 0 : index
    %3 = vector.load %arg2[%c0, %c0_1] : memref<16x32xbf16, #tpu.memory_space<vmem>>, vector<16x32xbf16>
    %c0_2 = arith.constant 0 : index
    %c0_3 = arith.constant 0 : index
    %4 = vector.load %arg3[%c0_2, %c0_3] : memref<32x64xbf16, #tpu.memory_space<vmem>>, vector<32x64xbf16>
    %cst = arith.constant dense<0.000000e+00> : vector<16x64xf32>
    %5 = tpu.matmul %3, %4, %cst {dimension_numbers = #tpu.dot_dimension_numbers<[1], [0], [0], [1], [0, 0, 1, 1], [], []>} : vector<16x32xbf16>, vector<32x64xbf16>, vector<16x64xf32> -> vector<16x64xf32>
    %c0_4 = arith.constant 0 : index
    %c0_5 = arith.constant 0 : index
    %6 = vector.load %arg4[%c0_4, %c0_5] : memref<1x64xf32, #tpu.memory_space<vmem>>, vector<1x64xf32>
    %7 = vector.broadcast %6 : vector<1x64xf32> to vector<16x64xf32>
    %8 = arith.addf %5, %7 : vector<16x64xf32>
    %cst_6 = arith.constant 0.000000e+00 : f32
    %9 = vector.broadcast %cst_6 : f32 to vector<16x64xf32>
    %10 = arith.maximumf %8, %9 : vector<16x64xf32>
    %c0_7 = arith.constant 0 : index
    %c0_8 = arith.constant 0 : index
    %11 = vector.load %arg8[%c0_7, %c0_8] : memref<16x32xf32, #tpu.memory_space<vmem>>, vector<16x32xf32>
    %12 = arith.truncf %10 : vector<16x64xf32> to vector<16x64xbf16>
    %c0_9 = arith.constant 0 : index
    %c0_10 = arith.constant 0 : index
    %13 = vector.load %arg5[%c0_9, %c0_10] : memref<64x32xbf16, #tpu.memory_space<vmem>>, vector<64x32xbf16>
    %cst_11 = arith.constant dense<0.000000e+00> : vector<16x32xf32>
    %14 = tpu.matmul %12, %13, %cst_11 {dimension_numbers = #tpu.dot_dimension_numbers<[1], [0], [0], [1], [0, 0, 1, 1], [], []>} : vector<16x64xbf16>, vector<64x32xbf16>, vector<16x32xf32> -> vector<16x32xf32>
    %15 = arith.addf %11, %14 : vector<16x32xf32>
    %c0_12 = arith.constant 0 : index
    %c0_13 = arith.constant 0 : index
    %16 = vector.load %arg8[%c0_12, %c0_13] : memref<16x32xf32, #tpu.memory_space<vmem>>, vector<16x32xf32>
    tpu.vector_store %arg8[%c0_12, %c0_13], %15 {strides = array<i32>} : memref<16x32xf32, #tpu.memory_space<vmem>>, vector<16x32xf32>,
    %c0_i32_14 = arith.constant 0 : i32
    %17 = arith.cmpi eq, %arg1, %c0_i32_14 : i32
    %18 = arith.extui %17 : i1 to i32
    %c0_i32_15 = arith.constant 0 : i32
    %19 = arith.cmpi ne, %18, %c0_i32_15 : i32
    scf.if %19 {
      %c0_16 = arith.constant 0 : index
      %c0_17 = arith.constant 0 : index
      %20 = vector.load %arg8[%c0_16, %c0_17] : memref<16x32xf32, #tpu.memory_space<vmem>>, vector<16x32xf32>
      %c0_18 = arith.constant 0 : index
      %c0_19 = arith.constant 0 : index
      %21 = vector.load %arg6[%c0_18, %c0_19] : memref<1x32xf32, #tpu.memory_space<vmem>>, vector<1x32xf32>
      %22 = vector.broadcast %21 : vector<1x32xf32> to vector<16x32xf32>
      %23 = arith.addf %20, %22 : vector<16x32xf32>
      %c0_20 = arith.constant 0 : index
      %c0_21 = arith.constant 0 : index
      %24 = vector.load %arg7[%c0_20, %c0_21] : memref<16x32xf32, #tpu.memory_space<vmem>>, vector<16x32xf32>
      tpu.vector_store %arg7[%c0_20, %c0_21], %23 {strides = array<i32>} : memref<16x32xf32, #tpu.memory_space<vmem>>, vector<16x32xf32>,
    } else {
    }
    return
  }
  func.func @transform_0(%arg0: i32, %arg1: i32) -> (i32, i32) {
    %c0_i32 = arith.constant 0 : i32
    %c0_i32_0 = arith.constant 0 : i32
    return %arg0, %c0_i32 : i32, i32
  }
  func.func @transform_1(%arg0: i32, %arg1: i32) -> (i32, i32) {
    %c0_i32 = arith.constant 0 : i32
    %c0_i32_0 = arith.constant 0 : i32
    return %c0_i32, %arg1 : i32, i32
  }
  func.func @transform_2(%arg0: i32, %arg1: i32) -> (i32, i32) {
    %c0_i32 = arith.constant 0 : i32
    %c0_i32_0 = arith.constant 0 : i32
    return %c0_i32, %arg1 : i32, i32
  }
  func.func @transform_3(%arg0: i32, %arg1: i32) -> (i32, i32) {
    %c0_i32 = arith.constant 0 : i32
    %c0_i32_0 = arith.constant 0 : i32
    return %arg1, %c0_i32 : i32, i32
  }
  func.func @transform_4(%arg0: i32, %arg1: i32) -> (i32, i32) {
    %c0_i32 = arith.constant 0 : i32
    %c0_i32_0 = arith.constant 0 : i32
    %c0_i32_1 = arith.constant 0 : i32
    return %c0_i32, %c0_i32_0 : i32, i32
  }
  func.func @transform_5(%arg0: i32, %arg1: i32) -> (i32, i32) {
    %c0_i32 = arith.constant 0 : i32
    %c0_i32_0 = arith.constant 0 : i32
    return %arg0, %c0_i32 : i32, i32
  }
}

</mosaic_0001>

<bundles_post_ra>
// kernel: tpu_custom_call.1
= control target key start
LH: loop header
LB: loop body
LE: loop exit
PB: predicated region body
PF: predicated region fallthrough
CT: control target
= control target key end

     0   :  { %v297_v1 = vmov 0.0   ;;  %vm298_vm0 = vmmov 0   ;;  %vm26_vm1 = vcmask 261120   ;;  %s378_s0 = inlined_call_operand.vmem [shape: bf16[16,32], index: 0, kind: input, shape index: {}]   ;;  %s379_s1 = inlined_call_operand.vmem [shape: bf16[32,64], index: 1, kind: input, shape index: {}]   ;;  %s380_s2 = inlined_call_operand.vmem [shape: f32[1,64], index: 2, kind: input, shape index: {}]   ;;  %s381_s3 = inlined_call_operand.vmem [shape: bf16[64,32], index: 3, kind: input, shape index: {}]   ;;  %s382_s4 = inlined_call_operand.vmem [shape: f32[1,32], index: 4, kind: input, shape index: {}]   ;;  %s383_s5 = inlined_call_operand.hbm [shape: f32[16,32], index: 5, kind: output, shape index: {}]  }
   0x1   :  { %v266_v0 = vld [vmem:[%s379_s1] sm:$0xff]   ;;  %241 = vmatprep.subr.bf16.mxu0 %v297_v1  ;;  %249 = vmatprep.subr.bf16.mxu1 %v297_v1  ;;  %v267_v2 = vld [vmem:[%s379_s1 + $0x8] sm:$0xff]   ;;  %27 = vst.msk [vmem:[#allocation2] sm:$0xff] %vm26_vm1, %v297_v1  ;;  %28 = vst.msk [vmem:[#allocation2 + $0x8] sm:$0xff] %vm26_vm1, %v297_v1 }
   0x2   :  { %242 = vmatpush3.bf16.msra.mxu0 %v266_v0  ;;  %245 = vmatprep.mubr.msk.bf16.mxu0 %vm298_vm0, %v297_v1  ;;  %v269_v3 = vld [vmem:[%s381_s3] sm:$0xff]   ;;  %v270_v5 = vld [vmem:[%s381_s3 + $0x8] sm:$0xff]  }
   0x3   :  { %243 = vmatprep.subr.bf16.mxu0 %v297_v1  ;;  %257 = vmatprep.mubr.msk.bf16.mxu1 %vm298_vm0, %v297_v1  ;;  %v268_v4 = vld [vmem:[%s378_s0] sm:$0xff]  }
   0x4   :  { %250 = vmatpush3.bf16.msra.mxu1 %v269_v3 }
   0x5   :  { %251 = vmatprep.subr.bf16.mxu1 %v297_v1 }
   0x6   :  { %244 = vmatpush3.bf16.msra.mxu0 %v267_v2 }
   0x7   :  { %10 = vsyncpa [#allocation4], 0  ;;  %v271_v6 = vld [vmem:[%s381_s3 + $0x10] sm:$0xff]   ;;  %v272_v7 = vld [vmem:[%s381_s3 + $0x18] sm:$0xff]   ;;  %vm141_vm2 = vcmask 523264   ;;  %s299_s7 = smov [#allocation3]  }
   0x8   :  { %252 = vmatpush3.bf16.msra.mxu1 %v270_v5  ;;  %v222_v8 = vld [vmem:[%s380_s2] ss:$0 sm:$0xff]  ;;  %v107_v20 = vld [vmem:[#allocation2 + $0x8] sm:$0xff]  ;;  %s211_s8 = sshll.u32 %s299_s7, 4  ;;  %s212_s8 = int_to_ptr.vmem [resolvable:$true] %s211_s8 }
   0x9   :  { %246 = vmatmul.mubr.msk.bf16.vlgmr.msra.gmra.mrb[0].mxu0 %vm26_vm1, %v268_v4  ;;  %253 = vmatprep.subr.bf16.mxu1 %v297_v1  ;;  %v106_v18 = vld [vmem:[#allocation2] sm:$0xff]  ;;  %s273_s9 = scalar_lea.vmem %s212_s8, 256  ;;  %p278_p1 = scmp.lt.s32.totalorder %s212_s8, %s212_s8 }
   0xa   :  { %v232_v26 = vld [vmem:[%s382_s4] ss:$0 sm:$0xff]  ;;  %p274_p0 = scmp.ne.s32.totalorder %s212_s8, %s273_s9  ;;  %p279_p2 = scmp.lt.s32.totalorder %s273_s9, %s273_s9 }
   0xc   :  { %254 = vmatpush3.bf16.msra.mxu1 %v271_v6  ;;  %p280_p3 = por %p279_p2, %p278_p1 }
   0xd   :  { %255 = vmatprep.subr.bf16.mxu1 %v297_v1 }
   0xe   :  { %p281_p4 = pnand %p280_p3, %p274_p0 }
  0x10   :  { %256 = vmatpush3.bf16.msra.mxu1 %v272_v7 }
  0xdc   :  { %v97_v9 = vpop.f32.mrb[0].mxu0 }
  0xdd   :  { %v98_v10 = vadd.f32 %v222_v8, %v97_v9  ;;  %v247_v11 = vpop.f32.mrb[1].mxu0 }
  0xde   :  { %v100_v12 = vpop.f32.mrb[2].mxu0 }
  0xdf   :  { %v101_v13 = vadd.f32 %v222_v8, %v100_v12  ;;  %v248_v14 = vpop.f32.mrb[3].mxu0  ;;  %v104_v15 = vmax.f32 %v98_v10, 0.0 }
  0xe1   :  { %v105_v16 = vmax.f32 %v101_v13, 0.0 }
  0xe3   :  { %v108_v17 = vpack.c.bf16 %v105_v16, %v104_v15 }
  0xe5   :  { %258 = vmatmul.mubr.msk.bf16.vlgmr.msra.gmra.mrb[0].mxu1 %vm141_vm2, %v108_v17 }
 0x1b8   :  { %v179_v19 = vpop.f32.mrb[0].mxu1 }
 0x1b9   :  { %v186_v21 = vadd.f32 %v179_v19, %v106_v18  ;;  %v259_v22 = vpop.f32.mrb[1].mxu1 }
 0x1ba   :  { %v182_v23 = vpop.f32.mrb[2].mxu1 }
 0x1bb   :  { %188 = vst.msk [vmem:[#allocation2] sm:$0xff] %vm26_vm1, %v186_v21  ;;  %v187_v24 = vadd.f32 %v182_v23, %v107_v20  ;;  %v260_v25 = vpop.f32.mrb[3].mxu1 }
 0x1bd   :  { %189 = vst.msk [vmem:[#allocation2 + $0x8] sm:$0xff] %vm26_vm1, %v187_v24 }
 0x1c2   :  { %v193_v27 = vld [vmem:[#allocation2] sm:$0xff] }
 0x1c3   :  { %v202_v28 = vadd.f32 %v232_v26, %v193_v27 }
 0x1c4   :  { %v194_v29 = vld [vmem:[#allocation2 + $0x8] sm:$0xff] }
 0x1c5   :  { %v203_v30 = vadd.f32 %v232_v26, %v194_v29  ;;  %204 = vst.msk [vmem:[#allocation3] sm:$0xff] %vm26_vm1, %v202_v28 }
 0x1c7   :  { %205 = vst.msk [vmem:[#allocation3 + $0x8] sm:$0xff] %vm26_vm1, %v203_v30 }
 0x1c8   :  { %284 = shalt.err (!%p281_p4)
}
 0x1c9   :  { %s285_s11 = scalar_lea.hbm %s383_s5, 256 }
 0x1ca   :  { %p286_p5 = scmp.ne.s32.totalorder %s383_s5, %s285_s11  ;;  %p289_p6 = scmp.lt.u32.totalorder %s285_s11, %s383_s5 }
 0x1cc   :  { %p291_p7 = pnand %p289_p6, %p286_p5 }
 0x1ce   :  { %294 = shalt.err (!%p291_p7)
}
 0x1cf   :  { %s300_s16 = smov 128   ;;  %s301_s17 = smov 8  }
 0x1d0   :  { %217 = dma.vmem_to_hbm [thread:$0]  %s212_s8, 256, %s383_s5, [#allocation4], %s300_s16, %s300_s16, %s301_s17  }
 0x1d1   :  { %295 = dma.done.wait [#allocation4], 256  }
 0x1d2   :  { %296 = vsyncadd [#allocation4], 4294967040 }
 0x1d3   :  { %221 = vsyncpa [#allocation4], 1 }

</bundles_post_ra>
